<compile_context>
chip_gen: v7x
topology: tpu7x:2x2x1
jax: 0.10.0
libtpu: 0.0.40
codegen_flags: <defaults>
</compile_context>

<pallas_src>
import functools

import jax
import jax.numpy as jnp
import numpy as np
from jax.experimental import pallas as pl
from jax.experimental.pallas import tpu as pltpu

EPS = 1e-12
_LANE = 128


def _round_up(x, m):
    return (x + m - 1) // m * m


def _spectral_conv_kernel(x_ref, wtap_ref, wmat_ref, u_ref, b_ref, out_ref,
                          *, n_kh, n_kw, wp):
    """One batch-group tile of the fused spectral-norm conv.

    x_ref    : (C, TILE_L)     padded input images, flattened & lane-aligned
    wtap_ref : (KH*KW, O, C)   raw weight, one (O, C) slab per tap
    wmat_ref : (O, C*KH*KW)    raw weight as a matrix (power iteration)
    u_ref    : (1, O)          left singular-vector estimate
    b_ref    : (O, 1)          conv bias (column -> broadcasts over lanes)
    out_ref  : (O, TILE_L)     lane-dense output tile
    """
    # ---- power iteration (1 step) + sigma: tiny (O x CKK), f32, VPU/EUP ----
    # Kept off the MXU critical path: the big matmuls below use the raw
    # weight; the accumulator is scaled by 1/sigma at the very end.
    w = wmat_ref[...].astype(jnp.float32)                        # (O, CKK)
    u = u_ref[...].astype(jnp.float32)                           # (1, O)
    wtu = jnp.dot(u, w, preferred_element_type=jnp.float32)      # (1, CKK)
    v = wtu * jax.lax.rsqrt(jnp.sum(wtu * wtu, keepdims=True) + EPS)
    wv = jnp.sum(w * v, axis=1, keepdims=True)                   # (O, 1)
    u_new = wv * jax.lax.rsqrt(jnp.sum(wv * wv, keepdims=True) + EPS)
    sigma = jnp.sum(u_new * wv, keepdims=True)                   # (1, 1)
    inv_sigma = pl.reciprocal(sigma)                             # exact (EUP)
    # TODO(synk): PyTorch's SpectralNorm persists the updated `u` buffer across
    # forward calls (training mode); this inference kernel does not write it back.

    # ---- conv as an accumulation over the KH*KW taps ------------------------
    x = x_ref[...]                                               # native dtype
    tile_l = x.shape[1]                                          # multiple of 128
    n_out = out_ref.shape[0]
    acc = jnp.zeros((n_out, tile_l), jnp.float32)
    for i_kh in range(n_kh):
        for i_kw in range(n_kw):
            shift = i_kh * wp + i_kw
            # Column p of x_s holds the input pixel at flat offset p + shift.
            # Wrap-around only lands in columns with h >= Ho or w >= Wo (or in
            # the per-image alignment tail), all of which the wrapper discards.
            if shift == 0:
                x_s = x
            else:
                x_s = pltpu.roll(x, shift=(tile_l - shift) % tile_l, axis=1)
            w_k = wtap_ref[i_kh * n_kw + i_kw]                   # (O, C)
            acc = acc + jnp.dot(w_k, x_s, preferred_element_type=jnp.float32)

    out = acc * inv_sigma + b_ref[...].astype(jnp.float32)
    out_ref[...] = out.astype(out_ref.dtype)


def spectral_norm_conv2d(x, w_bar, u, bias, padding=1):
    """Forward of SpectralNorm(nn.Conv2d(C, O, (KH, KW), padding=padding)).

    x     : (N, C, H, W)    NCHW, like PyTorch
    w_bar : (O, C, KH, KW)  raw (un-normalized) conv weight
    u     : (O,)            power-iteration left vector (l2-normalized)
    bias  : (O,)
    returns (N, O, Ho, Wo) NCHW
    """
    n, c, h, w = x.shape
    o, cw, kh, kw = w_bar.shape
    assert c == cw
    hp, wp = h + 2 * padding, w + 2 * padding
    ho, wo = hp - kh + 1, wp - kw + 1

    # --- glue: ONE zero-padded copy of x, flattened per image to a
    #     lane-aligned length (no KH*KW im2col duplication in HBM). ---
    l_img = _round_up(hp * wp, _LANE)
    xp = jnp.pad(x, ((0, 0), (0, 0), (padding, padding), (padding, padding)))
    x_flat = xp.transpose(1, 0, 2, 3).reshape(c, n, hp * wp)
    x_flat = jnp.pad(x_flat, ((0, 0), (0, 0), (0, l_img - hp * wp)))
    x_flat = x_flat.reshape(c, n * l_img)                        # (C, N*Limg)

    w_taps = w_bar.transpose(2, 3, 0, 1).reshape(kh * kw, o, c)  # (KHKW, O, C)
    w_mat = w_bar.reshape(o, c * kh * kw)                        # (O, CKK)
    u2 = u.reshape(1, o)
    b2 = bias.reshape(o, 1)

    # --- images per grid step: big enough to amortize the ~0.35us/step
    #     overhead, small enough to double-buffer in VMEM on every TPU gen
    #     (v7x has only 64 MiB physical / 32 MiB default-scoped), and >= 2
    #     steps when possible so DMA/compute actually overlap. ---
    img_bytes = c * l_img * x.dtype.itemsize
    group = 1
    for g in range(1, n + 1):
        if n % g:
            continue
        if g * img_bytes <= (2 << 20) and g <= max(1, n // 2):
            group = g
    tile_l = group * l_img                                       # multiple of 128
    grid = (n // group,)

    kernel = functools.partial(_spectral_conv_kernel, n_kh=kh, n_kw=kw, wp=wp)

    out_flat = pl.pallas_call(
        kernel,
        out_shape=jax.ShapeDtypeStruct((o, n * l_img), x.dtype),
        grid_spec=pltpu.PrefetchScalarGridSpec(
            num_scalar_prefetch=0,
            grid=grid,
            in_specs=[
                pl.BlockSpec((c, tile_l), lambda i: (0, i)),          # streamed
                pl.BlockSpec((kh * kw, o, c), lambda i: (0, 0, 0)),   # resident
                pl.BlockSpec((o, c * kh * kw), lambda i: (0, 0)),     # resident
                pl.BlockSpec((1, o), lambda i: (0, 0)),               # resident
                pl.BlockSpec((o, 1), lambda i: (0, 0)),               # resident
            ],
            out_specs=pl.BlockSpec((o, tile_l), lambda i: (0, i)),    # lane-dense
        ),
        compiler_params=pltpu.CompilerParams(
            dimension_semantics=("parallel",),        # megacore split (v7x)
            vmem_limit_bytes=32 * 1024 * 1024,
        ),
    )(x_flat, w_taps, w_mat, u2, b2)

    out = out_flat.reshape(o, n, l_img)[:, :, : hp * wp]
    out = out.reshape(o, n, hp, wp)[:, :, :ho, :wo]
    return out.transpose(1, 0, 2, 3)                              # (N, O, Ho, Wo)


def _reference(x, w_bar, u, bias, padding=1):
    """Pure-JAX reference reproducing the PyTorch semantics."""
    o = w_bar.shape[0]
    w_mat = w_bar.reshape(o, -1).astype(jnp.float32)
    v = w_mat.T @ u
    v = v / (jnp.linalg.norm(v) + EPS)
    u_new = w_mat @ v
    u_new = u_new / (jnp.linalg.norm(u_new) + EPS)
    sigma = jnp.dot(u_new, w_mat @ v)
    w_sn = (w_bar / sigma).astype(jnp.float32)
    out = jax.lax.conv_general_dilated(
        x.astype(jnp.float32), w_sn,
        window_strides=(1, 1), padding=[(padding, padding), (padding, padding)],
        dimension_numbers=("NCHW", "OIHW", "NCHW"),
    )
    return out + bias.reshape(1, o, 1, 1)


if __name__ == "__main__":
    key = jax.random.PRNGKey(0)
    k_x, k_w, k_u, k_b = jax.random.split(key, 4)

    N, C, H, W = 2, 4, 16, 16
    O, KH, KW = 8, 3, 3

    x = jax.random.normal(k_x, (N, C, H, W), dtype=jnp.float32)
    w_bar = jax.random.normal(k_w, (O, C, KH, KW), dtype=jnp.float32) * 0.1
    u = jax.random.normal(k_u, (O,), dtype=jnp.float32)
    u = u / (jnp.linalg.norm(u) + EPS)          # l2normalize, as in _make_params
    bias = jax.random.normal(k_b, (O,), dtype=jnp.float32) * 0.01

    out = spectral_norm_conv2d(x, w_bar, u, bias, padding=1)
    out = jax.block_until_ready(out)

    ref = jax.block_until_ready(_reference(x, w_bar, u, bias, padding=1))
    np.testing.assert_allclose(np.asarray(out), np.asarray(ref), rtol=1e-4, atol=1e-4)

    print("KERNEL_OK")
</pallas_src>

<mosaic_0001>
module attributes {stable_mosaic.version = 11 : i64} {
  func.func @_spectral_conv_kernel(%arg0: i32, %arg1: memref<4x384xf32, #tpu.memory_space<vmem>>, %arg2: memref<9x8x4xf32, #tpu.memory_space<vmem>>, %arg3: memref<8x36xf32, #tpu.memory_space<vmem>>, %arg4: memref<1x8xf32, #tpu.memory_space<vmem>>, %arg5: memref<8x1xf32, #tpu.memory_space<vmem>>, %arg6: memref<8x384xf32, #tpu.memory_space<vmem>>) attributes {dimension_semantics = [#tpu.dimension_semantics<parallel>], iteration_bounds = array<i64: 2>, scalar_prefetch = 0 : i64, scratch_operands = 0 : i64, tpu.core_type = #tpu.core_type<tc>, window_params = [{transform_indices = @transform_0, window_bounds = array<i64: 4, 384>}, {pipeline_mode = #tpu.pipeline_mode<synchronous>, transform_indices = @transform_1, window_bounds = array<i64: 9, 8, 4>}, {pipeline_mode = #tpu.pipeline_mode<synchronous>, transform_indices = @transform_2, window_bounds = array<i64: 8, 36>}, {pipeline_mode = #tpu.pipeline_mode<synchronous>, transform_indices = @transform_3, window_bounds = array<i64: 1, 8>}, {pipeline_mode = #tpu.pipeline_mode<synchronous>, transform_indices = @transform_4, window_bounds = array<i64: 8, 1>}, {transform_indices = @transform_5, window_bounds = array<i64: 8, 384>}]} {
    %c0 = arith.constant 0 : index
    %c0_0 = arith.constant 0 : index
    %0 = vector.load %arg3[%c0, %c0_0] : memref<8x36xf32, #tpu.memory_space<vmem>>, vector<8x36xf32>
    %c0_1 = arith.constant 0 : index
    %c0_2 = arith.constant 0 : index
    %1 = vector.load %arg4[%c0_1, %c0_2] : memref<1x8xf32, #tpu.memory_space<vmem>>, vector<1x8xf32>
    %cst = arith.constant dense<0.000000e+00> : vector<1x36xf32>
    %2 = tpu.matmul %1, %0, %cst {dimension_numbers = #tpu.dot_dimension_numbers<[1], [0], [0], [1], [0, 0, 1, 1], [], []>} : vector<1x8xf32>, vector<8x36xf32>, vector<1x36xf32> -> vector<1x36xf32>
    %3 = arith.mulf %2, %2 : vector<1x36xf32>
    %4 = vector.shape_cast %3 : vector<1x36xf32> to vector<1x1x36xf32>
    %cst_3 = arith.constant dense<0.000000e+00> : vector<1xf32>
    %5 = vector.multi_reduction <add>, %4, %cst_3 [1, 2] : vector<1x1x36xf32> to vector<1xf32>
    %6 = vector.shape_cast %5 : vector<1xf32> to vector<1x1x1xf32>
    %7 = vector.extract %6[0, 0, 0] : f32 from vector<1x1x1xf32>
    %8 = vector.broadcast %7 : f32 to vector<1x1xf32>
    %cst_4 = arith.constant 9.99999996E-13 : f32
    %9 = vector.broadcast %cst_4 : f32 to vector<1x1xf32>
    %10 = arith.addf %8, %9 : vector<1x1xf32>
    %11 = math.rsqrt %10 : vector<1x1xf32>
    %12 = vector.broadcast %11 : vector<1x1xf32> to vector<1x36xf32>
    %13 = arith.mulf %2, %12 : vector<1x36xf32>
    %14 = vector.broadcast %13 : vector<1x36xf32> to vector<8x36xf32>
    %15 = arith.mulf %0, %14 : vector<8x36xf32>
    %cst_5 = arith.constant dense<0.000000e+00> : vector<8xf32>
    %16 = vector.multi_reduction <add>, %15, %cst_5 [1] : vector<8x36xf32> to vector<8xf32>
    %17 = vector.shape_cast %16 : vector<8xf32> to vector<8x1xf32>
    %18 = arith.mulf %17, %17 : vector<8x1xf32>
    %19 = vector.shape_cast %18 : vector<8x1xf32> to vector<1x8x1xf32>
    %cst_6 = arith.constant dense<0.000000e+00> : vector<1xf32>
    %20 = vector.multi_reduction <add>, %19, %cst_6 [1, 2] : vector<1x8x1xf32> to vector<1xf32>
    %21 = vector.shape_cast %20 : vector<1xf32> to vector<1x1x1xf32>
    %22 = vector.extract %21[0, 0, 0] : f32 from vector<1x1x1xf32>
    %23 = vector.broadcast %22 : f32 to vector<1x1xf32>
    %cst_7 = arith.constant 9.99999996E-13 : f32
    %24 = vector.broadcast %cst_7 : f32 to vector<1x1xf32>
    %25 = arith.addf %23, %24 : vector<1x1xf32>
    %26 = math.rsqrt %25 : vector<1x1xf32>
    %27 = vector.broadcast %26 : vector<1x1xf32> to vector<8x1xf32>
    %28 = arith.mulf %17, %27 : vector<8x1xf32>
    %29 = arith.mulf %28, %17 : vector<8x1xf32>
    %30 = vector.shape_cast %29 : vector<8x1xf32> to vector<1x8x1xf32>
    %cst_8 = arith.constant dense<0.000000e+00> : vector<1xf32>
    %31 = vector.multi_reduction <add>, %30, %cst_8 [1, 2] : vector<1x8x1xf32> to vector<1xf32>
    %32 = vector.shape_cast %31 : vector<1xf32> to vector<1x1x1xf32>
    %33 = vector.extract %32[0, 0, 0] : f32 from vector<1x1x1xf32>
    %34 = vector.broadcast %33 : f32 to vector<1x1xf32>
    %35 = tpu.reciprocal %34 : vector<1x1xf32> -> vector<1x1xf32>
    %c0_9 = arith.constant 0 : index
    %c0_10 = arith.constant 0 : index
    %36 = vector.load %arg1[%c0_9, %c0_10] : memref<4x384xf32, #tpu.memory_space<vmem>>, vector<4x384xf32>
    %cst_11 = arith.constant 0.000000e+00 : f32
    %37 = vector.broadcast %cst_11 : f32 to vector<8x384xf32>
    %c0_12 = arith.constant 0 : index
    %c0_13 = arith.constant 0 : index
    %c0_14 = arith.constant 0 : index
    %38 = vector.load %arg2[%c0_12, %c0_13, %c0_14] : memref<9x8x4xf32, #tpu.memory_space<vmem>>, vector<1x8x4xf32>
    %39 = vector.shape_cast %38 : vector<1x8x4xf32> to vector<8x4xf32>
    %cst_15 = arith.constant dense<0.000000e+00> : vector<8x384xf32>
    %40 = tpu.matmul %39, %36, %cst_15 {dimension_numbers = #tpu.dot_dimension_numbers<[1], [0], [0], [1], [0, 0, 1, 1], [], []>} : vector<8x4xf32>, vector<4x384xf32>, vector<8x384xf32> -> vector<8x384xf32>
    %41 = arith.addf %37, %40 : vector<8x384xf32>
    %c383_i32 = arith.constant 383 : i32
    %42 = tpu.dynamic_rotate %36 by %c383_i32 dim 1 : vector<4x384xf32>, i32 -> vector<4x384xf32>
    %c1 = arith.constant 1 : index
    %c0_16 = arith.constant 0 : index
    %c0_17 = arith.constant 0 : index
    %43 = vector.load %arg2[%c1, %c0_16, %c0_17] : memref<9x8x4xf32, #tpu.memory_space<vmem>>, vector<1x8x4xf32>
    %44 = vector.shape_cast %43 : vector<1x8x4xf32> to vector<8x4xf32>
    %cst_18 = arith.constant dense<0.000000e+00> : vector<8x384xf32>
    %45 = tpu.matmul %44, %42, %cst_18 {dimension_numbers = #tpu.dot_dimension_numbers<[1], [0], [0], [1], [0, 0, 1, 1], [], []>} : vector<8x4xf32>, vector<4x384xf32>, vector<8x384xf32> -> vector<8x384xf32>
    %46 = arith.addf %41, %45 : vector<8x384xf32>
    %c382_i32 = arith.constant 382 : i32
    %47 = tpu.dynamic_rotate %36 by %c382_i32 dim 1 : vector<4x384xf32>, i32 -> vector<4x384xf32>
    %c2 = arith.constant 2 : index
    %c0_19 = arith.constant 0 : index
    %c0_20 = arith.constant 0 : index
    %48 = vector.load %arg2[%c2, %c0_19, %c0_20] : memref<9x8x4xf32, #tpu.memory_space<vmem>>, vector<1x8x4xf32>
    %49 = vector.shape_cast %48 : vector<1x8x4xf32> to vector<8x4xf32>
    %cst_21 = arith.constant dense<0.000000e+00> : vector<8x384xf32>
    %50 = tpu.matmul %49, %47, %cst_21 {dimension_numbers = #tpu.dot_dimension_numbers<[1], [0], [0], [1], [0, 0, 1, 1], [], []>} : vector<8x4xf32>, vector<4x384xf32>, vector<8x384xf32> -> vector<8x384xf32>
    %51 = arith.addf %46, %50 : vector<8x384xf32>
    %c366_i32 = arith.constant 366 : i32
    %52 = tpu.dynamic_rotate %36 by %c366_i32 dim 1 : vector<4x384xf32>, i32 -> vector<4x384xf32>
    %c3 = arith.constant 3 : index
    %c0_22 = arith.constant 0 : index
    %c0_23 = arith.constant 0 : index
    %53 = vector.load %arg2[%c3, %c0_22, %c0_23] : memref<9x8x4xf32, #tpu.memory_space<vmem>>, vector<1x8x4xf32>
    %54 = vector.shape_cast %53 : vector<1x8x4xf32> to vector<8x4xf32>
    %cst_24 = arith.constant dense<0.000000e+00> : vector<8x384xf32>
    %55 = tpu.matmul %54, %52, %cst_24 {dimension_numbers = #tpu.dot_dimension_numbers<[1], [0], [0], [1], [0, 0, 1, 1], [], []>} : vector<8x4xf32>, vector<4x384xf32>, vector<8x384xf32> -> vector<8x384xf32>
    %56 = arith.addf %51, %55 : vector<8x384xf32>
    %c365_i32 = arith.constant 365 : i32
    %57 = tpu.dynamic_rotate %36 by %c365_i32 dim 1 : vector<4x384xf32>, i32 -> vector<4x384xf32>
    %c4 = arith.constant 4 : index
    %c0_25 = arith.constant 0 : index
    %c0_26 = arith.constant 0 : index
    %58 = vector.load %arg2[%c4, %c0_25, %c0_26] : memref<9x8x4xf32, #tpu.memory_space<vmem>>, vector<1x8x4xf32>
    %59 = vector.shape_cast %58 : vector<1x8x4xf32> to vector<8x4xf32>
    %cst_27 = arith.constant dense<0.000000e+00> : vector<8x384xf32>
    %60 = tpu.matmul %59, %57, %cst_27 {dimension_numbers = #tpu.dot_dimension_numbers<[1], [0], [0], [1], [0, 0, 1, 1], [], []>} : vector<8x4xf32>, vector<4x384xf32>, vector<8x384xf32> -> vector<8x384xf32>
    %61 = arith.addf %56, %60 : vector<8x384xf32>
    %c364_i32 = arith.constant 364 : i32
    %62 = tpu.dynamic_rotate %36 by %c364_i32 dim 1 : vector<4x384xf32>, i32 -> vector<4x384xf32>
    %c5 = arith.constant 5 : index
    %c0_28 = arith.constant 0 : index
    %c0_29 = arith.constant 0 : index
    %63 = vector.load %arg2[%c5, %c0_28, %c0_29] : memref<9x8x4xf32, #tpu.memory_space<vmem>>, vector<1x8x4xf32>
    %64 = vector.shape_cast %63 : vector<1x8x4xf32> to vector<8x4xf32>
    %cst_30 = arith.constant dense<0.000000e+00> : vector<8x384xf32>
    %65 = tpu.matmul %64, %62, %cst_30 {dimension_numbers = #tpu.dot_dimension_numbers<[1], [0], [0], [1], [0, 0, 1, 1], [], []>} : vector<8x4xf32>, vector<4x384xf32>, vector<8x384xf32> -> vector<8x384xf32>
    %66 = arith.addf %61, %65 : vector<8x384xf32>
    %c348_i32 = arith.constant 348 : i32
    %67 = tpu.dynamic_rotate %36 by %c348_i32 dim 1 : vector<4x384xf32>, i32 -> vector<4x384xf32>
    %c6 = arith.constant 6 : index
    %c0_31 = arith.constant 0 : index
    %c0_32 = arith.constant 0 : index
    %68 = vector.load %arg2[%c6, %c0_31, %c0_32] : memref<9x8x4xf32, #tpu.memory_space<vmem>>, vector<1x8x4xf32>
    %69 = vector.shape_cast %68 : vector<1x8x4xf32> to vector<8x4xf32>
    %cst_33 = arith.constant dense<0.000000e+00> : vector<8x384xf32>
    %70 = tpu.matmul %69, %67, %cst_33 {dimension_numbers = #tpu.dot_dimension_numbers<[1], [0], [0], [1], [0, 0, 1, 1], [], []>} : vector<8x4xf32>, vector<4x384xf32>, vector<8x384xf32> -> vector<8x384xf32>
    %71 = arith.addf %66, %70 : vector<8x384xf32>
    %c347_i32 = arith.constant 347 : i32
    %72 = tpu.dynamic_rotate %36 by %c347_i32 dim 1 : vector<4x384xf32>, i32 -> vector<4x384xf32>
    %c7 = arith.constant 7 : index
    %c0_34 = arith.constant 0 : index
    %c0_35 = arith.constant 0 : index
    %73 = vector.load %arg2[%c7, %c0_34, %c0_35] : memref<9x8x4xf32, #tpu.memory_space<vmem>>, vector<1x8x4xf32>
    %74 = vector.shape_cast %73 : vector<1x8x4xf32> to vector<8x4xf32>
    %cst_36 = arith.constant dense<0.000000e+00> : vector<8x384xf32>
    %75 = tpu.matmul %74, %72, %cst_36 {dimension_numbers = #tpu.dot_dimension_numbers<[1], [0], [0], [1], [0, 0, 1, 1], [], []>} : vector<8x4xf32>, vector<4x384xf32>, vector<8x384xf32> -> vector<8x384xf32>
    %76 = arith.addf %71, %75 : vector<8x384xf32>
    %c346_i32 = arith.constant 346 : i32
    %77 = tpu.dynamic_rotate %36 by %c346_i32 dim 1 : vector<4x384xf32>, i32 -> vector<4x384xf32>
    %c8 = arith.constant 8 : index
    %c0_37 = arith.constant 0 : index
    %c0_38 = arith.constant 0 : index
    %78 = vector.load %arg2[%c8, %c0_37, %c0_38] : memref<9x8x4xf32, #tpu.memory_space<vmem>>, vector<1x8x4xf32>
    %79 = vector.shape_cast %78 : vector<1x8x4xf32> to vector<8x4xf32>
    %cst_39 = arith.constant dense<0.000000e+00> : vector<8x384xf32>
    %80 = tpu.matmul %79, %77, %cst_39 {dimension_numbers = #tpu.dot_dimension_numbers<[1], [0], [0], [1], [0, 0, 1, 1], [], []>} : vector<8x4xf32>, vector<4x384xf32>, vector<8x384xf32> -> vector<8x384xf32>
    %81 = arith.addf %76, %80 : vector<8x384xf32>
    %82 = vector.broadcast %35 : vector<1x1xf32> to vector<8x384xf32>
    %83 = arith.mulf %81, %82 : vector<8x384xf32>
    %c0_40 = arith.constant 0 : index
    %c0_41 = arith.constant 0 : index
    %84 = vector.load %arg5[%c0_40, %c0_41] : memref<8x1xf32, #tpu.memory_space<vmem>>, vector<8x1xf32>
    %85 = vector.broadcast %84 : vector<8x1xf32> to vector<8x384xf32>
    %86 = arith.addf %83, %85 : vector<8x384xf32>
    %c0_42 = arith.constant 0 : index
    %c0_43 = arith.constant 0 : index
    %87 = vector.load %arg6[%c0_42, %c0_43] : memref<8x384xf32, #tpu.memory_space<vmem>>, vector<8x384xf32>
    tpu.vector_store %arg6[%c0_42, %c0_43], %86 {strides = array<i32>} : memref<8x384xf32, #tpu.memory_space<vmem>>, vector<8x384xf32>,
    return
  }
  func.func @transform_0(%arg0: i32) -> (i32, i32) {
    %c0_i32 = arith.constant 0 : i32
    %c0_i32_0 = arith.constant 0 : i32
    return %c0_i32, %arg0 : i32, i32
  }
  func.func @transform_1(%arg0: i32) -> (i32, i32, i32) {
    %c0_i32 = arith.constant 0 : i32
    %c0_i32_0 = arith.constant 0 : i32
    %c0_i32_1 = arith.constant 0 : i32
    %c0_i32_2 = arith.constant 0 : i32
    return %c0_i32, %c0_i32_0, %c0_i32_1 : i32, i32, i32
  }
  func.func @transform_2(%arg0: i32) -> (i32, i32) {
    %c0_i32 = arith.constant 0 : i32
    %c0_i32_0 = arith.constant 0 : i32
    %c0_i32_1 = arith.constant 0 : i32
    return %c0_i32, %c0_i32_0 : i32, i32
  }
  func.func @transform_3(%arg0: i32) -> (i32, i32) {
    %c0_i32 = arith.constant 0 : i32
    %c0_i32_0 = arith.constant 0 : i32
    %c0_i32_1 = arith.constant 0 : i32
    return %c0_i32, %c0_i32_0 : i32, i32
  }
  func.func @transform_4(%arg0: i32) -> (i32, i32) {
    %c0_i32 = arith.constant 0 : i32
    %c0_i32_0 = arith.constant 0 : i32
    %c0_i32_1 = arith.constant 0 : i32
    return %c0_i32, %c0_i32_0 : i32, i32
  }
  func.func @transform_5(%arg0: i32) -> (i32, i32) {
    %c0_i32 = arith.constant 0 : i32
    %c0_i32_0 = arith.constant 0 : i32
    return %c0_i32, %arg0 : i32, i32
  }
}

</mosaic_0001>

<bundles_post_ra>
// kernel: tpu_custom_call.1
= control target key start
LH: loop header
LB: loop body
LE: loop exit
PB: predicated region body
PF: predicated region fallthrough
CT: control target
= control target key end

     0   :  { %10 = vsyncpa [#allocation3], 0  ;;  %s2610_s0 = inlined_call_operand.vmem [shape: f32[4,768], index: 0, kind: input, shape index: {}]   ;;  %s2611_s1 = inlined_call_operand.vmem [shape: f32[9,8,4], index: 1, kind: input, shape index: {}]   ;;  %s2612_s2 = inlined_call_operand.vmem [shape: f32[8,36], index: 2, kind: input, shape index: {}]   ;;  %s2613_s3 = inlined_call_operand.vmem [shape: f32[1,8], index: 3, kind: input, shape index: {}]   ;;  %s2614_s4 = inlined_call_operand.vmem [shape: f32[8,1], index: 4, kind: input, shape index: {}]   ;;  %s2615_s5 = inlined_call_operand.hbm [shape: f32[8,768], index: 5, kind: output, shape index: {}]  }
   0x1   :  { %12 = vsyncpa [#allocation3 + $0x1], 0  ;;  %s2284_s18 = smov 0   ;;  %s2286_s19 = smov 0  }
   0x2   :  { %s2288_s20 = smov 0   ;;  %s2290_s21 = smov 0  }
   0x3 LB: > { %s2305_s22 = sadd.s32 4294967295, %s2240_s21   ;;  %s1947_s23 = sadd.s32 4294967294, %s2240_s21   ;;  %s2240_s21 = sphi %s2290_s21, %s2621_s21   ;;  %s2236_s20 = sphi %s2288_s20, %s2620_s20   ;;  %s2232_s19 = sphi %s2286_s19, %s2619_s19   ;;  %s2228_s18 = sphi %s2284_s18, %s2618_s18  }
   0x4   : > { %s2309_s24 = sadd.s32 1, %s2240_s21   ;;  %s135_s25 = sadd.s32 1, %s2236_s20 }
   0x5   : > { %s132_s26 = ssub.s32 %s2240_s21, %s2309_s24  ;;  %p145_p0 = scmp.ne.s32.totalorder %s2236_s20, %s2232_s19 }
   0x6   : > { %p133_p1 = scmp.eq.s32.totalorder %s132_s26, 0  ;;  %p146_p2 = scmp.eq.s32.totalorder %s2305_s22, 1 }
   0x7   : > { %p151_p3 = scmp.ne.s32.totalorder %s2232_s19, %s2228_s18  ;;  %p152_p4 = scmp.eq.s32.totalorder %s1947_s23, 1 }
   0x8   : > { %s2320_s27 = scalar_select %p133_p1, %s2236_s20, %s135_s25  }
   0x9   : > { %p2322_p5 = por %p146_p2, %p145_p0  ;;  %p2326_p6 = por %p152_p4, %p151_p3 }
   0xa   : > { %p1950_p7 = scmp.ge.s32.totalorder %s2240_s21, 1  ;;  %p191_p8 = scmp.lt.s32.totalorder %s2240_s21, 3 }
   0xc   : > { %p192_p9 = pnand %p1950_p7, %p191_p8 }
   0xd   : > { %v226_v0 = vld [vmem:[%s2612_s2] sm:$0xff] (!%p192_p9)  ;;  %vm228_vm0 = vcmask (!%p192_p9), 64512   ;;  %v2242_v2 = vmov (!%p192_p9), 0.0   ;;  %vm2243_vm1 = vmmov (!%p192_p9), 0   ;;  %vm303_vm2 = vcmask (!%p192_p9), 286720   ;;  %s219_s9 = smul.u32 (!%p192_p9), 3, %s2305_s22 }
   0xe   : > { %195 = sbr.rel (%p192_p9) target bundleno = 1059 (0x423), region = 40  ;;  %v227_v1 = vld [vmem:[%s2613_s3] sm:$0x1] (!%p192_p9)  ;;  %2030 = vmatprep.subr.mxu0 (!%p192_p9), %v2242_v2  ;;  %2032 = vmatprep.mubr.msk.f32.mxu0 (!%p192_p9), %vm2243_vm1, %v2242_v2  ;;  %s2244_s14 = smov (!%p192_p9), 127   ;;  %v318_v19 = vlaneseq (!%p192_p9)  ;;  %vm323_vm3 = vcmask (!%p192_p9), 293888   ;;  %vm381_vm5 = vcmask (!%p192_p9), 1043456  }
   0xf   : > { %2031 = vmatpush3.msra.mxu0 (!%p192_p9), %v226_v0  ;;  %455 = vmatprep.mubr.f32.mxu1 (!%p192_p9), %v2242_v2  ;;  %p220_p10 = scmp.lt.s32.totalorder (!%p192_p9), %s219_s9, 5  ;;  %s2245_s15 = smov (!%p192_p9), 126   ;;  %vm328_vm6 = vcmask (!%p192_p9), 7168   ;;  %v1953_v38 = vld [vmem:[%s2611_s1 + $0x8] sm:$0xff] (!%p192_p9)  ;;  %vm377_vm7 = vcmask (!%p192_p9), 31744   ;;  %v358_v45 = vld [vmem:[%s2611_s1] sm:$0xff] (!%p192_p9) }
  0x10   : > { %2033 = vmatmul.mubr.msk.f32.vlgmr.msra.gmra.mrb[0].mxu0 (!%p192_p9), %vm228_vm0, %v227_v1  ;;  %2035 = vmatprep.subr.mxu0 (!%p192_p9), %v2242_v2  ;;  %s2246_s16 = smov (!%p192_p9), 110   ;;  %s2247_s17 = smov (!%p192_p9), 109   ;;  %v319_v20 = vshrl.u32 (!%p192_p9), %v318_v19, 7  ;;  %v2371_v28 = vand.u32 (!%p192_p9), 127, %v318_v19  ;;  %v1964_v52 = vld [vmem:[%s2611_s1 + $0x10] sm:$0xff] (!%p192_p9)  ;;  %v1970_v59 = vld [vmem:[%s2611_s1 + $0x18] sm:$0xff] (!%p192_p9) }
  0x11   : > { %2037 = vmatprep.mubr.msk.f32.mxu0 (!%p192_p9), %vm2243_vm1, %v2242_v2  ;;  %s2248_s25 = smov (!%p192_p9), 108   ;;  %s2249_s26 = smov (!%p192_p9), 92   ;;  %v1976_v1 = vld [vmem:[%s2611_s1 + $0x20] sm:$0xff] (!%p192_p9)  ;;  %v1994_v19 = vld [vmem:[%s2611_s1 + $0x38] sm:$0xff] (!%p192_p9) }
  0x12   : > { %v320_v21 = vsub.s32 (!%p192_p9), 0, %v319_v20  ;;  %vm371_vm4 = vcmp.lt.s32.totalorder (!%p192_p9), %v2371_v28, 127  ;;  %s2250_s30 = smov (!%p192_p9), 91   ;;  %s2251_s6 = smov (!%p192_p9), 90   ;;  %vm688_vm8 = vcmp.lt.s32.totalorder (!%p192_p9), %v2371_v28, 126  ;;  %vm856_vm9 = vcmp.lt.s32.totalorder (!%p192_p9), %v2371_v28, 110 }
  0x13   : > { %vm1024_vm10 = vcmp.lt.s32.totalorder (!%p192_p9), %v2371_v28, 109  ;;  %vm1192_vm11 = vcmp.lt.s32.totalorder (!%p192_p9), %v2371_v28, 108  ;;  %vm1360_vm12 = vcmp.lt.s32.totalorder (!%p192_p9), %v2371_v28, 92  ;;  %vm1528_vm13 = vcmp.lt.s32.totalorder (!%p192_p9), %v2371_v28, 91 }
  0x14   : > { %vm1696_vm14 = vcmp.lt.s32.totalorder (!%p192_p9), %v2371_v28, 90 }
  0x15   : > { %s2623_s9 = smov (!%p220_p10, %s219_s9), 5 }
  0x16   : > { %s1951_s10 = sshll.u32 %s2623_s9, 2 }
  0x17   : > { %s223_s13 = scalar_lea.vmem %s2610_s0, %s1951_s10 }
  0x18   : > { %v2349_v7 = vld [vmem:[%s223_s13] sm:$0xff]  ;;  %v2357_v9 = vld [vmem:[%s223_s13 + $0x8] sm:$0xf]  ;;  %s216_s13 = sand.u32 1, %s2232_s19  }
  0x19   : > { %v2353_v8 = vcombine.high %v2349_v7, %v2349_v7 }
  0x1b   : > { %365 = vrot.lane.b32.xlu1 %v2353_v8, %s2244_s14 }
  0x1f   : > { %367 = vrot.lane.b32.xlu1 %v2357_v9, %s2244_s14 }
  0x23   : > { %684 = vrot.lane.b32.xlu1 %v2353_v8, %s2245_s15 }
  0x27   : > { %686 = vrot.lane.b32.xlu1 %v2357_v9, %s2245_s15 }
  0x2b   : > { %682 = vrot.lane.b32.xlu1 %v2349_v7, %s2245_s15  ;;  %s2009_s15 = smul.u32 384, %s2305_s22  ;;  %s1874_s22 = scalar_lea.sflag [#allocation3], %s216_s13 }
  0x2f   : > { %852 = vrot.lane.b32.xlu1 %v2353_v8, %s2246_s16 }
  0x33   : > { %854 = vrot.lane.b32.xlu1 %v2357_v9, %s2246_s16 }
  0x37   : > { %850 = vrot.lane.b32.xlu1 %v2349_v7, %s2246_s16 }
  0x3b   : > { %1022 = vrot.lane.b32.xlu1 %v2357_v9, %s2247_s17 }
  0x8d   : > { %v366_v27 = vpop.permute.xlu1 %365 }
  0x91   : > { %v368_v29 = vpop.permute.xlu1 %367 }
  0x92   : > { %v372_v30 = vsel %vm371_vm4, %v366_v27, %v368_v29 }
  0x93   : > { %1954 = vmatprep.subr.msk.mxu1 %vm381_vm5, %v372_v30 }
  0x95   : > { %v685_v31 = vpop.permute.xlu1 %684 }
  0x99   : > { %v687_v32 = vpop.permute.xlu1 %686 }
  0x9a   : > { %v689_v42 = vsel %vm688_vm8, %v685_v31, %v687_v32 }
  0x9d   : > { %v683_v33 = vpop.permute.xlu1 %682 }
  0x9e   : > { %v690_v47 = vsel %vm688_vm8, %v683_v33, %v685_v31  ;;  %v691_v48 = vsel %vm688_vm8, %v687_v32, %v683_v33 }
  0xa1   : > { %v853_v39 = vpop.permute.xlu1 %852 }
  0xa5   : > { %v855_v44 = vpop.permute.xlu1 %854 }
  0xa6   : > { %v857_v49 = vsel %vm856_vm9, %v853_v39, %v855_v44 }
  0xa9   : > { %v851_v50 = vpop.permute.xlu1 %850 }
  0xaa   : > { %v858_v55 = vsel %vm856_vm9, %v851_v50, %v853_v39  ;;  %v859_v56 = vsel %vm856_vm9, %v855_v44, %v851_v50 }
  0xad   : > { %v1023_v53 = vpop.permute.xlu1 %1022 }
  0xe3   : > { %v298_v3 = vpop.f32.mrb[0].mxu0 }
  0xe4   : > { %v2034_v4 = vpop.f32.mrb[1].mxu0  ;;  %v302_v5 = vmul.f32 %v298_v3, %v298_v3 }
  0xe6   : > { %v304_v6 = vsel %vm303_vm2, %v302_v5, 0.0 }
  0xe7   : > { %305 = vadd.xlane.f32.xlu0 %v304_v6 }
 0x174   : > { %v306_v10 = vpop.xlane.xlu0 %305 }
 0x175   : > { %v307_v11 = vrot.slane %v306_v10, 4 }
 0x177   : > { %v308_v12 = vadd.f32 %v307_v11, %v306_v10 }
 0x179   : > { %v309_v13 = vrot.slane %v308_v12, 2 }
 0x17b   : > { %v310_v14 = vadd.f32 %v309_v13, %v308_v12 }
 0x17d   : > { %v311_v15 = vrot.slane %v310_v14, 1 }
 0x17f   : > { %v312_v16 = vadd.f32 %v311_v15, %v310_v14  ;;  %v1988_v14 = vld [vmem:[%s2611_s1 + $0x30] sm:$0xff] }
 0x181   : > { %2113 = vpush %v312_v16 }
 0x1b2   : > { %s2114_s23 = spop %2113 }
 0x1b3   : > { %v314_v17 = vstv %s2114_s23 }
 0x1b4   : > { %v315_v18 = vadd.f32 1e-12, %v314_v17 }
 0x1b6   : > { %2172 = vrsqrt.f32 %v315_v18 }
 0x1c0   : > { %v2173_v22 = vpop.eup %2172 }
 0x1c1   : > { %v317_v23 = vmul.f32 %v2173_v22, %v298_v3  ;;  %v1861_v22 = vld [vmem:[%s2614_s4] sm:$0xff] }
 0x1c3   : > { %v321_v24 = vrot.slane %v317_v23, %v320_v21  ;;  %v2000_v21 = vld [vmem:[%s2611_s1 + $0x40] sm:$0xff]  ;;  %v2252_v23 = vmov 0  }
 0x1c4   : > { %2169 = vset.pattern.permute.xlu1 %v2252_v23  ;;  %2170 = vset.pattern.permute.xlu0 %v2252_v23 }
 0x1c5   : > { %v322_v25 = vmul.f32 %v321_v24, %v226_v0 }
 0x1c7   : > { %v324_v26 = vsel %vm323_vm3, %v322_v25, 0.0 }
 0x1c8   : > { %325 = vadd.xlane.f32.xlu0 %v324_v26 }
 0x1de   : > { %363 = vrot.lane.b32.xlu0 %v2349_v7, %s2244_s14  ;;  %s2112_s14 = smul.u32 24, %s216_s13 }
 0x1e0   : > { %s218_s16 = scalar_lea.vmem [#allocation2], %s2112_s14 }
 0x1e2   : > { %1020 = vrot.lane.b32.xlu0 %v2353_v8, %s2247_s17 }
 0x1e6   : > { %1018 = vrot.lane.b32.xlu0 %v2349_v7, %s2247_s17  ;;  %s1888_s17 = sshll.u32 %s218_s16, 4  ;;  %s2570_s17 = int_to_ptr.vmem [resolvable:$true] %s1888_s17 }
 0x1ea   : > { %1188 = vrot.lane.b32.xlu0 %v2353_v8, %s2248_s25 }
 0x1ee   : > { %1190 = vrot.lane.b32.xlu0 %v2357_v9, %s2248_s25 }
 0x1f2   : > { %1186 = vrot.lane.b32.xlu0 %v2349_v7, %s2248_s25 }
 0x1f6   : > { %1356 = vrot.lane.b32.xlu0 %v2353_v8, %s2249_s26 }
 0x1fa   : > { %1358 = vrot.lane.b32.xlu0 %v2357_v9, %s2249_s26 }
 0x1fe   : > { %1354 = vrot.lane.b32.xlu0 %v2349_v7, %s2249_s26  ;;  %s2568_s26 = scalar_lea.hbm %s2615_s5, %s2009_s15 }
 0x202   : > { %1524 = vrot.lane.b32.xlu0 %v2353_v8, %s2250_s30 }
 0x206   : > { %1526 = vrot.lane.b32.xlu0 %v2357_v9, %s2250_s30 }
 0x20a   : > { %1522 = vrot.lane.b32.xlu0 %v2349_v7, %s2250_s30  ;;  %s2178_s30 = scalar_lea.vmem %s2570_s17, 384 }
 0x20b   : > { %p2179_p11 = scmp.ne.s32.totalorder %s2570_s17, %s2178_s30 }
 0x20d   : > { %p2180_p12 = pnand %p2179_p11, %p2322_p5 }
 0x20e   : > { %1694 = vrot.lane.b32.xlu0 %v2357_v9, %s2251_s6 }
 0x20f   : > { %p2181_p13 = pneg %p2180_p12 }
 0x212   : > { %1690 = vrot.lane.b32.xlu0 %v2349_v7, %s2251_s6 }
 0x255   : > { %v2391_v34 = vpop.xlane.xlu0 %325 }
 0x256   : > { %v327_v35 = vmul.f32 %v2391_v34, %v2391_v34 }
 0x258   : > { %v329_v36 = vsel %vm328_vm6, %v327_v35, 0.0 }
 0x259   : > { %330 = vadd.xlane.f32.xlu1 %v329_v36  ;;  %v364_v37 = vpop.permute.xlu0 %363 }
 0x25a   : > { %v374_v40 = vsel %vm371_vm4, %v368_v29, %v364_v37  ;;  %v373_v41 = vsel %vm371_vm4, %v364_v37, %v366_v27 }
 0x25b   : > { %1955 = vmatpush1.msk.msra.mxu1 %vm381_vm5, %v373_v41  ;;  %2036 = vmatpush3.msk.msra.mxu0 %vm381_vm5, %v374_v40 }
 0x25c   : > { %1956 = vmatmul.mubr.msk.f32.vlgmr.msra.gmra.mrb[0].mxu1 %vm377_vm7, %v1953_v38  ;;  %2038 = vmatmul.mubr.msk.f32.vlgmr.msra.gmra.mrb[2].mxu0 %vm377_vm7, %v1953_v38 }
 0x25d   : > { %1959 = vmatprep.subr.msk.mxu1 %vm381_vm5, %v2353_v8  ;;  %605 = vmatprep.mubr.f32.mxu1 %v2242_v2  ;;  %v1021_v43 = vpop.permute.xlu0 %1020 }
 0x25e   : > { %1960 = vmatpush1.msk.msra.mxu1 %vm381_vm5, %v2349_v7  ;;  %2040 = vmatprep.subr.mxu0 %v2242_v2  ;;  %v1025_v57 = vsel %vm1024_vm10, %v1021_v43, %v1023_v53 }
 0x25f   : > { %1965 = vmatprep.subr.msk.mxu1 %vm381_vm5, %v689_v42  ;;  %2041 = vmatpush3.msk.msra.mxu0 %vm381_vm5, %v2357_v9 }
 0x260   : > { %2042 = vmatprep.mubr.msk.f32.mxu0 %vm2243_vm1, %v2242_v2  ;;  %2045 = vmatprep.subr.mxu0 %v2242_v2 }
 0x261   : > { %v1019_v46 = vpop.permute.xlu0 %1018 }
 0x262   : > { %v1026_v61 = vsel %vm1024_vm10, %v1019_v46, %v1021_v43  ;;  %v1027_v62 = vsel %vm1024_vm10, %v1023_v53, %v1019_v46 }
 0x264   : > { %1961 = vmatmul.mubr.msk.f32.vlgmr.msra.gmra.mrb[0].mxu1 %vm377_vm7, %v358_v45  ;;  %2043 = vmatmul.mubr.msk.f32.vlgmr.msra.gmra.mrb[2].mxu0 %vm377_vm7, %v358_v45 }
 0x265   : > { %1966 = vmatpush1.msk.msra.mxu1 %vm381_vm5, %v690_v47  ;;  %2046 = vmatpush3.msk.msra.mxu0 %vm381_vm5, %v691_v48  ;;  %v1189_v51 = vpop.permute.xlu0 %1188 }
 0x266   : > { %770 = vmatprep.mubr.f32.mxu1 %v2242_v2  ;;  %1971 = vmatprep.subr.msk.mxu1 %vm381_vm5, %v857_v49 }
 0x267   : > { %2047 = vmatprep.mubr.msk.f32.mxu0 %vm2243_vm1, %v2242_v2  ;;  %2050 = vmatprep.subr.mxu0 %v2242_v2 }
 0x269   : > { %v1191_v54 = vpop.permute.xlu0 %1190 }
 0x26a   : > { %1692 = vrot.lane.b32.xlu1 %v2353_v8, %s2251_s6  ;;  %v1193_v63 = vsel %vm1192_vm11, %v1189_v51, %v1191_v54  ;;  %v1982_v8 = vld [vmem:[%s2611_s1 + $0x28] sm:$0xff]  ;;  %s2253_s6 = smov [#allocation2]  }
 0x26b   : > { %s2182_s7 = sshll.u32 %s2253_s6, 4  ;;  %s2183_s7 = int_to_ptr.vmem [resolvable:$false] %s2182_s7 }
 0x26c   : > { %1967 = vmatmul.mubr.msk.f32.vlgmr.msra.gmra.mrb[0].mxu1 %vm377_vm7, %v1964_v52  ;;  %2048 = vmatmul.mubr.msk.f32.vlgmr.msra.gmra.mrb[2].mxu0 %vm377_vm7, %v1964_v52  ;;  %s2184_s8 = scalar_lea.vmem %s2183_s7, 768  ;;  %p2185_p0 = scmp.lt.s32.totalorder %s2570_s17, %s2183_s7 }
 0x26d   : > { %1972 = vmatpush1.msk.msra.mxu1 %vm381_vm5, %v858_v55  ;;  %2051 = vmatpush3.msk.msra.mxu0 %vm381_vm5, %v859_v56  ;;  %v1187_v58 = vpop.permute.xlu0 %1186  ;;  %p2186_p1 = scmp.lt.s32.totalorder %s2184_s8, %s2178_s30 }
 0x26e   : > { %2052 = vmatprep.mubr.msk.f32.mxu0 %vm2243_vm1, %v2242_v2  ;;  %2055 = vmatprep.subr.mxu0 %v2242_v2  ;;  %v1194_v4 = vsel %vm1192_vm11, %v1187_v58, %v1189_v51  ;;  %v1195_v5 = vsel %vm1192_vm11, %v1191_v54, %v1187_v58 }
 0x26f   : > { %1977 = vmatprep.subr.msk.mxu1 %vm381_vm5, %v1025_v57  ;;  %938 = vmatprep.mubr.f32.mxu1 %v2242_v2  ;;  %p2187_p2 = por %p2186_p1, %p2185_p0 }
 0x270   : > { %1864 = vperm.xlu1 %2169, %v1861_v22  }
 0x271   : > { %v1357_v60 = vpop.permute.xlu0 %1356  ;;  %p2188_p3 = pnand %p2187_p2, %p2181_p13 }
 0x274   : > { %2053 = vmatmul.mubr.msk.f32.vlgmr.msra.gmra.mrb[2].mxu0 %vm377_vm7, %v1970_v59  ;;  %1973 = vmatmul.mubr.msk.f32.vlgmr.msra.gmra.mrb[0].mxu1 %vm377_vm7, %v1970_v59 }
 0x275   : > { %2056 = vmatpush3.msk.msra.mxu0 %vm381_vm5, %v1027_v62  ;;  %1978 = vmatpush1.msk.msra.mxu1 %vm381_vm5, %v1026_v61  ;;  %v1359_v0 = vpop.permute.xlu0 %1358 }
 0x276   : > { %1106 = vmatprep.mubr.f32.mxu1 %v2242_v2  ;;  %2057 = vmatprep.mubr.msk.f32.mxu0 %vm2243_vm1, %v2242_v2  ;;  %v1361_v6 = vsel %vm1360_vm12, %v1357_v60, %v1359_v0 }
 0x277   : > { %1983 = vmatprep.subr.msk.mxu1 %vm381_vm5, %v1193_v63  ;;  %2060 = vmatprep.subr.mxu0 %v2242_v2 }
 0x279   : > { %v1355_v3 = vpop.permute.xlu0 %1354 }
 0x27a   : > { %v1362_v10 = vsel %vm1360_vm12, %v1355_v3, %v1357_v60  ;;  %v1363_v11 = vsel %vm1360_vm12, %v1359_v0, %v1355_v3 }
 0x27c   : > { %1979 = vmatmul.mubr.msk.f32.vlgmr.msra.gmra.mrb[0].mxu1 %vm377_vm7, %v1976_v1  ;;  %2058 = vmatmul.mubr.msk.f32.vlgmr.msra.gmra.mrb[2].mxu0 %vm377_vm7, %v1976_v1 }
 0x27d   : > { %1984 = vmatpush1.msk.msra.mxu1 %vm381_vm5, %v1194_v4  ;;  %1274 = vmatprep.mubr.f32.mxu1 %v2242_v2  ;;  %v1525_v7 = vpop.permute.xlu0 %1524 }
 0x27e   : > { %2061 = vmatpush3.msk.msra.mxu0 %vm381_vm5, %v1195_v5  ;;  %2062 = vmatprep.mubr.msk.f32.mxu0 %vm2243_vm1, %v2242_v2 }
 0x27f   : > { %1989 = vmatprep.subr.msk.mxu1 %vm381_vm5, %v1361_v6  ;;  %2065 = vmatprep.subr.mxu0 %v2242_v2 }
 0x281   : > { %v1527_v9 = vpop.permute.xlu0 %1526 }
 0x282   : > { %v1529_v12 = vsel %vm1528_vm13, %v1525_v7, %v1527_v9 }
 0x284   : > { %1985 = vmatmul.mubr.msk.f32.vlgmr.msra.gmra.mrb[0].mxu1 %vm377_vm7, %v1982_v8  ;;  %2063 = vmatmul.mubr.msk.f32.vlgmr.msra.gmra.mrb[2].mxu0 %vm377_vm7, %v1982_v8 }
 0x285   : > { %1990 = vmatpush1.msk.msra.mxu1 %vm381_vm5, %v1362_v10  ;;  %1442 = vmatprep.mubr.f32.mxu1 %v2242_v2  ;;  %v1523_v13 = vpop.permute.xlu0 %1522 }
 0x286   : > { %2066 = vmatpush3.msk.msra.mxu0 %vm381_vm5, %v1363_v11  ;;  %2067 = vmatprep.mubr.msk.f32.mxu0 %vm2243_vm1, %v2242_v2  ;;  %v1530_v16 = vsel %vm1528_vm13, %v1523_v13, %v1525_v7  ;;  %v1531_v17 = vsel %vm1528_vm13, %v1527_v9, %v1523_v13 }
 0x287   : > { %1995 = vmatprep.subr.msk.mxu1 %vm381_vm5, %v1529_v12  ;;  %2070 = vmatprep.subr.mxu0 %v2242_v2 }
 0x289   : > { %v1695_v15 = vpop.permute.xlu0 %1694 }
 0x28c   : > { %1991 = vmatmul.mubr.msk.f32.vlgmr.msra.gmra.mrb[0].mxu1 %vm377_vm7, %v1988_v14  ;;  %2068 = vmatmul.mubr.msk.f32.vlgmr.msra.gmra.mrb[2].mxu0 %vm377_vm7, %v1988_v14 }
 0x28d   : > { %1996 = vmatpush1.msk.msra.mxu1 %vm381_vm5, %v1530_v16  ;;  %1610 = vmatprep.mubr.f32.mxu1 %v2242_v2  ;;  %v1691_v18 = vpop.permute.xlu0 %1690 }
 0x28e   : > { %2071 = vmatpush3.msk.msra.mxu0 %vm381_vm5, %v1531_v17  ;;  %2072 = vmatprep.mubr.msk.f32.mxu0 %vm2243_vm1, %v2242_v2  ;;  %v1699_v20 = vsel %vm1696_vm14, %v1695_v15, %v1691_v18 }
 0x28f   : > { %2075 = vmatprep.subr.mxu0 %v2242_v2 }
 0x294   : > { %1997 = vmatmul.mubr.msk.f32.vlgmr.msra.gmra.mrb[0].mxu1 %vm377_vm7, %v1994_v19  ;;  %2073 = vmatmul.mubr.msk.f32.vlgmr.msra.gmra.mrb[2].mxu0 %vm377_vm7, %v1994_v19 }
 0x295   : > { %1778 = vmatprep.mubr.f32.mxu1 %v2242_v2  ;;  %2076 = vmatpush3.msk.msra.mxu0 %vm381_vm5, %v1699_v20 }
 0x296   : > { %2077 = vmatprep.mubr.msk.f32.mxu0 %vm2243_vm1, %v2242_v2 }
 0x29c   : > { %2078 = vmatmul.mubr.msk.f32.vlgmr.msra.gmra.mrb[2].mxu0 %vm377_vm7, %v2000_v21 }
 0x2e6   : > { %v331_v24 = vpop.xlane.xlu1 %330 }
 0x2e7   : > { %v332_v25 = vrot.slane %v331_v24, 4 }
 0x2e9   : > { %v333_v26 = vadd.f32 %v332_v25, %v331_v24 }
 0x2ea   : > { %v1693_v27 = vpop.permute.xlu1 %1692 }
 0x2eb   : > { %v334_v29 = vrot.slane %v333_v26, 2  ;;  %v1697_v2 = vsel %vm1696_vm14, %v1693_v27, %v1695_v15  ;;  %v1698_v30 = vsel %vm1696_vm14, %v1691_v18, %v1693_v27 }
 0x2ec   : > { %2001 = vmatprep.subr.msk.mxu1 %vm381_vm5, %v1697_v2 }
 0x2ed   : > { %v335_v31 = vadd.f32 %v334_v29, %v333_v26  ;;  %2002 = vmatpush1.msk.msra.mxu1 %vm381_vm5, %v1698_v30 }
 0x2ee   : > { %2003 = vmatmul.mubr.msk.f32.vlgmr.msra.gmra.mrb[0].mxu1 %vm377_vm7, %v2000_v21 }
 0x2ef   : > { %v336_v32 = vrot.slane %v335_v31, 1  ;;  %v1865_v52 = vpop.permute.xlu1 %1864 }
 0x2f1   : > { %v337_v33 = vadd.f32 %v336_v32, %v335_v31 }
 0x2f3   : > { %2115 = vpush %v337_v33 }
 0x324   : > { %s2116_s11 = spop %2115 }
 0x325   : > { %v339_v35 = vstv %s2116_s11 }
 0x326   : > { %v340_v36 = vadd.f32 1e-12, %v339_v35 }
 0x328   : > { %2174 = vrsqrt.f32 %v340_v36 }
 0x332   : > { %v2175_v37 = vpop.eup %2174 }
 0x333   : > { %v342_v38 = vmul.f32 %v2175_v37, %v2391_v34 }
 0x335   : > { %v343_v28 = vmul.f32 %v342_v38, %v2391_v34 }
 0x337   : > { %v344_v39 = vsel %vm328_vm6, %v343_v28, 0.0 }
 0x338   : > { %345 = vadd.xlane.f32.xlu0 %v344_v39 }
 0x36f   : > { %v1851_v40 = vpop.f32.mrb[2].mxu0 }
 0x370   : > { %v2079_v41 = vpop.f32.mrb[3].mxu0 }
 0x3c1   : > { %v1780_v42 = vpop.f32.mrb[0].mxu1 }
 0x3c2   : > { %v1782_v43 = vpop.f32.mrb[1].mxu1 }
 0x3c5   : > { %v346_v44 = vpop.xlane.xlu0 %345 }
 0x3c6   : > { %v347_v45 = vrot.slane %v346_v44, 4 }
 0x3c8   : > { %v348_v46 = vadd.f32 %v347_v45, %v346_v44 }
 0x3ca   : > { %v349_v47 = vrot.slane %v348_v46, 2 }
 0x3cc   : > { %v350_v48 = vadd.f32 %v349_v47, %v348_v46 }
 0x3ce   : > { %v351_v49 = vrot.slane %v350_v48, 1 }
 0x3d0   : > { %v352_v50 = vadd.f32 %v351_v49, %v350_v48 }
 0x3d2   : > { %2117 = vpush %v352_v50 }
 0x403   : > { %s2118_s12 = spop %2117 }
 0x404   : > { %v354_v51 = vstv %s2118_s12 }
 0x405   : > { %2176 = vrcp.f32 %v354_v51 }
 0x40f   : > { %v2177_v34 = vpop.eup %2176 }
 0x410   : > { %v1858_v53 = vmul.f32 %v2177_v34, %v1780_v42  ;;  %v1859_v54 = vmul.f32 %v2177_v34, %v1782_v43  ;;  %v1860_v55 = vmul.f32 %v2177_v34, %v1851_v40 }
 0x412   : > { %v1867_v56 = vadd.f32 %v1865_v52, %v1858_v53  ;;  %v1868_v57 = vadd.f32 %v1865_v52, %v1859_v54  ;;  %v1869_v58 = vadd.f32 %v1865_v52, %v1860_v55 }
 0x414   : > { %1870 = vst [vmem:[%s218_s16] sm:$0xff] %v1867_v56  ;;  %1871 = vst [vmem:[%s218_s16 + $0x8] sm:$0xff] %v1868_v57 }
 0x415   : > { %1872 = vst [vmem:[%s218_s16 + $0x10] sm:$0xff] %v1869_v58 }
 0x416   : > { %2191 = shalt.err (!%p2188_p3)
}
 0x417   : > { %s2192_s9 = scalar_lea.hbm %s2568_s26, 384  ;;  %s2196_s12 = scalar_lea.hbm %s2615_s5, 768 }
 0x418   : > { %p2193_p4 = scmp.ne.s32.totalorder %s2568_s26, %s2192_s9  ;;  %p2197_p9 = scmp.lt.u32.totalorder %s2568_s26, %s2615_s5 }
 0x419   : > { %p2198_p10 = scmp.lt.u32.totalorder %s2196_s12, %s2192_s9  ;;  %p2200_p12 = scmp.lt.u32.totalorder %s2192_s9, %s2568_s26 }
 0x41a   : > { %p2194_p7 = pnand %p2193_p4, %p2322_p5 }
 0x41b   : > { %p2199_p11 = por %p2198_p10, %p2197_p9 }
 0x41c   : > { %p2195_p8 = pneg %p2194_p7 }
 0x41d   : > { %p2201_p13 = por %p2200_p12, %p2199_p11 }
 0x41f   : > { %p2202_p0 = pnand %p2201_p13, %p2195_p8 }
 0x421   : > { %2205 = shalt.err (!%p2202_p0)
}
 0x422   : > { %2119 = dma.vmem_to_hbm [thread:$0]  (%p2322_p5), %s2570_s17, 384, %s2568_s26, %s1874_s22  }
 0x423 PF: > { %p2125_p1 = scmp.ge.s32.totalorder %s2240_s21, 2  ;;  %s1900_s15 = sand.u32 1, %s2228_s18  }
 0x424   : > { %s1901_s16 = scalar_lea.sflag [#allocation3], %s1900_s15 }
 0x425   : > { %p2122_p2 = pnand %p2125_p1, %p2326_p6 }
 0x427   : > { %2223 = dma.done.wait (!%p2122_p2), %s1901_s16, 384  }
 0x428   : > { %2225 = vsyncadd (!%p2122_p2), %s1901_s16, 4294966912  ;;  %p15_p3 = scmp.ge.s32.totalorder %s2309_s24, 4   ;;  %s2618_s18 = smov %s2232_s19 }
 0x429   : > { %s2619_s19 = smov %s2236_s20  ;;  %s2620_s20 = smov %s2320_s27 }
 0x42a   : > { %s2621_s21 = smov %s2309_s24  ;;  %17 = sbr.rel (!%p15_p3) target bundleno = 3 (0x3), region = 83 }
 0x431   :  { %1906 = vsyncpa [#allocation3], 1 }
 0x432   :  { %1908 = vsyncpa [#allocation3 + $0x1], 1 }

</bundles_post_ra>
